<compile_context>
chip_gen: v7x
topology: tpu7x:2x2x1
jax: 0.10.0
libtpu: 0.0.40
codegen_flags: <defaults>
</compile_context>

<pallas_src>
import jax
import jax.numpy as jnp
from jax.experimental import pallas as pl
from jax.experimental.pallas import tpu as pltpu


def sdpa_dropout_kernel(scale_ref, p_ref, q_ref, k_ref, v_ref, u_ref, o_ref):
    scale = scale_ref[0]
    p = p_ref[0]

    q = q_ref[...]          # (B, M, D)
    k = k_ref[...]          # (B, N, D)
    v = v_ref[...]          # (B, N, Dv)
    u = u_ref[...]          # (B, M, N) uniforms in [0, 1)

    B, M, _ = q.shape
    Dv = v.shape[-1]

    # qk = query @ key^T (contract last dims, no materialized transpose)
    s = jnp.einsum("bmd,bnd->bmn", q, k,
                   preferred_element_type=jnp.float32)          # (B, M, N)
    s = s * scale

    # numerically-stable softmax numerator / denominator
    m = jnp.max(s, axis=-1, keepdims=True)
    e = jnp.exp(s - m)
    denom = jnp.sum(e, axis=-1, keepdims=True)                  # (B, M, 1)

    # dropout: keep with prob (1 - p); fold the 1/(1-p) rescale into the
    # softmax normalization.  p >= 1 -> output is exactly zero.
    keep = (u >= p).astype(jnp.float32)
    inv = jnp.where(
        p < 1.0,
        1.0 / (denom * jnp.maximum(1.0 - p, jnp.float32(1e-20))),
        jnp.float32(0.0),
    )
    probs = e * keep * inv                                      # (B, M, N)

    out = jnp.einsum("bmn,bnd->bmd", probs, v,
                     preferred_element_type=jnp.float32)        # (B, M, Dv)

    # Fold batch into the sublane dim (leading-dim collapse only; lanes kept).
    o_ref[...] = jnp.reshape(out, (B * M, Dv))


def sdpa_dropout(query, key, value, scale_factor, dropout_p, seed=0):
    """query: (B, M, D), key: (B, N, D), value: (B, N, Dv) -> (B, M, Dv)."""
    B, M, D = query.shape
    Bk, N, Dk = key.shape
    Bv, Nv, Dv = value.shape
    assert D == Dk and B == Bk == Bv and N == Nv

    scale_arr = jnp.asarray([scale_factor], dtype=jnp.float32)
    p_arr = jnp.asarray([dropout_p], dtype=jnp.float32)

    # Dropout uniforms: one seed, one (B, M, N) draw, done outside the kernel.
    # TODO(synk): not bit-compatible with torch's RNG stream (distributional
    # equivalence only), same caveat as any non-PyTorch dropout.
    u = jax.random.uniform(jax.random.PRNGKey(seed), (B, M, N),
                           dtype=jnp.float32)

    grid_spec = pltpu.PrefetchScalarGridSpec(
        num_scalar_prefetch=2,          # scale_factor, dropout_p -> SMEM
        grid=(1,),                      # single step: whole problem in VMEM
        in_specs=[
            pl.BlockSpec((B, M, D), lambda i, *_: (0, 0, 0)),   # query
            pl.BlockSpec((B, N, Dk), lambda i, *_: (0, 0, 0)),  # key
            pl.BlockSpec((B, N, Dv), lambda i, *_: (0, 0, 0)),  # value
            pl.BlockSpec((B, M, N), lambda i, *_: (0, 0, 0)),   # uniforms
        ],
        out_specs=pl.BlockSpec((B * M, Dv), lambda i, *_: (0, 0)),
    )

    out_flat = pl.pallas_call(
        sdpa_dropout_kernel,
        out_shape=jax.ShapeDtypeStruct((B * M, Dv), jnp.float32),
        grid_spec=grid_spec,
        compiler_params=pltpu.CompilerParams(
            dimension_semantics=("arbitrary",)),
    )(scale_arr, p_arr, query, key, value, u)

    return out_flat.reshape(B, M, Dv)


if __name__ == "__main__":
    # Small, self-consistent batched-attention shapes:
    # query (B, M, D), key (B, N, D), value (B, N, Dv).
    B, M, N, D, Dv = 2, 8, 16, 8, 8

    root = jax.random.PRNGKey(0)
    kq, kk, kv = jax.random.split(root, 3)
    query = jax.random.normal(kq, (B, M, D), dtype=jnp.float32)
    key = jax.random.normal(kk, (B, N, D), dtype=jnp.float32)
    value = jax.random.normal(kv, (B, N, Dv), dtype=jnp.float32)

    scale_factor = 10.0     # mirrors torch.tensor(10) at the call site
    dropout_p = 0.5         # non-degenerate dropout probability

    out = sdpa_dropout(query, key, value, scale_factor, dropout_p, seed=1234)
    jax.block_until_ready(out)
    assert out.shape == (B, M, Dv)
    assert jnp.all(jnp.isfinite(out))

    # Degenerate path: p >= 1 must give exactly zeros (matches F.dropout(p=1)).
    out_p1 = sdpa_dropout(query, key, value, scale_factor, 1.0, seed=1234)
    jax.block_until_ready(out_p1)
    assert jnp.all(out_p1 == 0.0)

    # Sanity: p = 0 is plain softmax-attention, so every output element must
    # lie inside the convex hull of the value vectors (small fp slack).
    out_p0 = sdpa_dropout(query, key, value, scale_factor, 0.0, seed=1234)
    jax.block_until_ready(out_p0)
    v_min = jnp.min(value, axis=1, keepdims=True)   # (B, 1, Dv)
    v_max = jnp.max(value, axis=1, keepdims=True)
    assert jnp.all(out_p0 >= v_min - 5e-2) and jnp.all(out_p0 <= v_max + 5e-2)

    print("KERNEL_OK")
</pallas_src>

<mosaic_0001>
module attributes {stable_mosaic.version = 11 : i64} {
  func.func @sdpa_dropout_kernel(%arg0: i32, %arg1: memref<1xf32, #tpu.memory_space<smem>>, %arg2: memref<1xf32, #tpu.memory_space<smem>>, %arg3: memref<2x8x8xf32, #tpu.memory_space<vmem>>, %arg4: memref<2x16x8xf32, #tpu.memory_space<vmem>>, %arg5: memref<2x16x8xf32, #tpu.memory_space<vmem>>, %arg6: memref<2x8x16xf32, #tpu.memory_space<vmem>>, %arg7: memref<16x8xf32, #tpu.memory_space<vmem>>) attributes {dimension_semantics = [#tpu.dimension_semantics<arbitrary>], iteration_bounds = array<i64: 1>, scalar_prefetch = 2 : i64, scratch_operands = 0 : i64, tpu.core_type = #tpu.core_type<tc>, window_params = [{pipeline_mode = #tpu.pipeline_mode<synchronous>, transform_indices = @transform_0, window_bounds = array<i64: 2, 8, 8>}, {pipeline_mode = #tpu.pipeline_mode<synchronous>, transform_indices = @transform_1, window_bounds = array<i64: 2, 16, 8>}, {pipeline_mode = #tpu.pipeline_mode<synchronous>, transform_indices = @transform_2, window_bounds = array<i64: 2, 16, 8>}, {pipeline_mode = #tpu.pipeline_mode<synchronous>, transform_indices = @transform_3, window_bounds = array<i64: 2, 8, 16>}, {pipeline_mode = #tpu.pipeline_mode<synchronous>, transform_indices = @transform_4, window_bounds = array<i64: 16, 8>}]} {
    %c0 = arith.constant 0 : index
    %0 = memref.load %arg1[%c0] : memref<1xf32, #tpu.memory_space<smem>>
    %c0_0 = arith.constant 0 : index
    %1 = memref.load %arg2[%c0_0] : memref<1xf32, #tpu.memory_space<smem>>
    %c0_1 = arith.constant 0 : index
    %c0_2 = arith.constant 0 : index
    %c0_3 = arith.constant 0 : index
    %2 = vector.load %arg3[%c0_1, %c0_2, %c0_3] : memref<2x8x8xf32, #tpu.memory_space<vmem>>, vector<2x8x8xf32>
    %c0_4 = arith.constant 0 : index
    %c0_5 = arith.constant 0 : index
    %c0_6 = arith.constant 0 : index
    %3 = vector.load %arg4[%c0_4, %c0_5, %c0_6] : memref<2x16x8xf32, #tpu.memory_space<vmem>>, vector<2x16x8xf32>
    %c0_7 = arith.constant 0 : index
    %c0_8 = arith.constant 0 : index
    %c0_9 = arith.constant 0 : index
    %4 = vector.load %arg5[%c0_7, %c0_8, %c0_9] : memref<2x16x8xf32, #tpu.memory_space<vmem>>, vector<2x16x8xf32>
    %c0_10 = arith.constant 0 : index
    %c0_11 = arith.constant 0 : index
    %c0_12 = arith.constant 0 : index
    %5 = vector.load %arg6[%c0_10, %c0_11, %c0_12] : memref<2x8x16xf32, #tpu.memory_space<vmem>>, vector<2x8x16xf32>
    "tpu.trace_start"() <{level = 10 : i32, message = "bmd,bnd->bmn"}> : () -> ()
    %cst = arith.constant dense<0.000000e+00> : vector<2x8x16xf32>
    %6 = tpu.matmul %2, %3, %cst {dimension_numbers = #tpu.dot_dimension_numbers<[2], [2], [1], [1], [0, 0, 0, 1, 1, 1], [0], [0]>} : vector<2x8x8xf32>, vector<2x16x8xf32>, vector<2x8x16xf32> -> vector<2x8x16xf32>
    "tpu.trace_stop"() : () -> ()
    %7 = vector.broadcast %0 : f32 to vector<2x8x16xf32>
    %8 = arith.mulf %6, %7 : vector<2x8x16xf32>
    %cst_13 = arith.constant dense<0xFF800000> : vector<2x8xf32>
    %9 = vector.multi_reduction <maximumf>, %8, %cst_13 [2] : vector<2x8x16xf32> to vector<2x8xf32>
    %10 = vector.shape_cast %9 : vector<2x8xf32> to vector<2x8x1xf32>
    %11 = vector.broadcast %10 : vector<2x8x1xf32> to vector<2x8x16xf32>
    %12 = arith.subf %8, %11 : vector<2x8x16xf32>
    %13 = math.exp %12 : vector<2x8x16xf32>
    %cst_14 = arith.constant dense<0.000000e+00> : vector<2x8xf32>
    %14 = vector.multi_reduction <add>, %13, %cst_14 [2] : vector<2x8x16xf32> to vector<2x8xf32>
    %15 = vector.shape_cast %14 : vector<2x8xf32> to vector<2x8x1xf32>
    %16 = vector.broadcast %1 : f32 to vector<2x8x16xf32>
    %17 = arith.cmpf oge, %5, %16 : vector<2x8x16xf32>
    %18 = arith.extui %17 : vector<2x8x16xi1> to vector<2x8x16xi32>
    %19 = arith.sitofp %18 : vector<2x8x16xi32> to vector<2x8x16xf32>
    %cst_15 = arith.constant 1.000000e+00 : f32
    %20 = arith.cmpf olt, %1, %cst_15 : f32
    %cst_16 = arith.constant 1.000000e+00 : f32
    %21 = arith.subf %cst_16, %1 : f32
    %cst_17 = arith.constant 9.99999968E-21 : f32
    %22 = arith.maximumf %21, %cst_17 : f32
    %23 = vector.broadcast %22 : f32 to vector<2x8x1xf32>
    %24 = arith.mulf %15, %23 : vector<2x8x1xf32>
    %cst_18 = arith.constant 1.000000e+00 : f32
    %25 = vector.broadcast %cst_18 : f32 to vector<2x8x1xf32>
    %26 = arith.divf %25, %24 : vector<2x8x1xf32>
    %cst_19 = arith.constant 0.000000e+00 : f32
    %27 = vector.broadcast %cst_19 : f32 to vector<2x8x1xf32>
    %28 = arith.select %20, %26, %27 : vector<2x8x1xf32>
    %29 = arith.mulf %13, %19 : vector<2x8x16xf32>
    %30 = vector.broadcast %28 : vector<2x8x1xf32> to vector<2x8x16xf32>
    %31 = arith.mulf %29, %30 : vector<2x8x16xf32>
    "tpu.trace_start"() <{level = 10 : i32, message = "bmn,bnd->bmd"}> : () -> ()
    %cst_20 = arith.constant dense<0.000000e+00> : vector<2x8x8xf32>
    %32 = tpu.matmul %31, %4, %cst_20 {dimension_numbers = #tpu.dot_dimension_numbers<[2], [1], [1], [2], [0, 0, 0, 1, 1, 2], [0], [0]>} : vector<2x8x16xf32>, vector<2x16x8xf32>, vector<2x8x8xf32> -> vector<2x8x8xf32>
    "tpu.trace_stop"() : () -> ()
    %33 = vector.shape_cast %32 : vector<2x8x8xf32> to vector<16x8xf32>
    %c0_21 = arith.constant 0 : index
    %c0_22 = arith.constant 0 : index
    %34 = vector.load %arg7[%c0_21, %c0_22] : memref<16x8xf32, #tpu.memory_space<vmem>>, vector<16x8xf32>
    tpu.vector_store %arg7[%c0_21, %c0_22], %33 {strides = array<i32>} : memref<16x8xf32, #tpu.memory_space<vmem>>, vector<16x8xf32>,
    return
  }
  func.func @transform_0(%arg0: i32, %arg1: memref<1xf32, #tpu.memory_space<smem>>, %arg2: memref<1xf32, #tpu.memory_space<smem>>) -> (i32, i32, i32) {
    %c0_i32 = arith.constant 0 : i32
    %c0_i32_0 = arith.constant 0 : i32
    %c0_i32_1 = arith.constant 0 : i32
    %c0_i32_2 = arith.constant 0 : i32
    return %c0_i32, %c0_i32_0, %c0_i32_1 : i32, i32, i32
  }
  func.func @transform_1(%arg0: i32, %arg1: memref<1xf32, #tpu.memory_space<smem>>, %arg2: memref<1xf32, #tpu.memory_space<smem>>) -> (i32, i32, i32) {
    %c0_i32 = arith.constant 0 : i32
    %c0_i32_0 = arith.constant 0 : i32
    %c0_i32_1 = arith.constant 0 : i32
    %c0_i32_2 = arith.constant 0 : i32
    return %c0_i32, %c0_i32_0, %c0_i32_1 : i32, i32, i32
  }
  func.func @transform_2(%arg0: i32, %arg1: memref<1xf32, #tpu.memory_space<smem>>, %arg2: memref<1xf32, #tpu.memory_space<smem>>) -> (i32, i32, i32) {
    %c0_i32 = arith.constant 0 : i32
    %c0_i32_0 = arith.constant 0 : i32
    %c0_i32_1 = arith.constant 0 : i32
    %c0_i32_2 = arith.constant 0 : i32
    return %c0_i32, %c0_i32_0, %c0_i32_1 : i32, i32, i32
  }
  func.func @transform_3(%arg0: i32, %arg1: memref<1xf32, #tpu.memory_space<smem>>, %arg2: memref<1xf32, #tpu.memory_space<smem>>) -> (i32, i32, i32) {
    %c0_i32 = arith.constant 0 : i32
    %c0_i32_0 = arith.constant 0 : i32
    %c0_i32_1 = arith.constant 0 : i32
    %c0_i32_2 = arith.constant 0 : i32
    return %c0_i32, %c0_i32_0, %c0_i32_1 : i32, i32, i32
  }
  func.func @transform_4(%arg0: i32, %arg1: memref<1xf32, #tpu.memory_space<smem>>, %arg2: memref<1xf32, #tpu.memory_space<smem>>) -> (i32, i32) {
    %c0_i32 = arith.constant 0 : i32
    %c0_i32_0 = arith.constant 0 : i32
    %c0_i32_1 = arith.constant 0 : i32
    return %c0_i32, %c0_i32_0 : i32, i32
  }
}

</mosaic_0001>

<bundles_post_ra>
// kernel: tpu_custom_call.1
= control target key start
LH: loop header
LB: loop body
LE: loop exit
PB: predicated region body
PF: predicated region fallthrough
CT: control target
= control target key end

     0   :  { %vm35_vm0 = vcmask 64512   ;;  %v470_v0 = vmov 0.0|0.0   ;;  %vm471_vm2 = vmmov 0   ;;  %v472_v6 = vmov 0.0   ;;  %s473_s19 = smov 1e-20   ;;  %s581_s3 = inlined_call_operand.vmem [shape: f32[2,16,8], index: 3, kind: input, shape index: {}]   ;;  %s582_s2 = inlined_call_operand.vmem [shape: f32[2,8,8], index: 2, kind: input, shape index: {}]   ;;  %s583_s0 = inlined_call_operand.<no memory space> [shape: f32[1], index: 0, kind: input, shape index: {}]   ;;  %s584_s4 = inlined_call_operand.vmem [shape: f32[2,16,8], index: 4, kind: input, shape index: {}]   ;;  %s585_s1 = inlined_call_operand.<no memory space> [shape: f32[1], index: 1, kind: input, shape index: {}]   ;;  %s586_s5 = inlined_call_operand.vmem [shape: f32[2,8,16], index: 5, kind: input, shape index: {}]   ;;  %s587_s6 = inlined_call_operand.vmem [shape: f32[16,8], index: 6, kind: output, shape index: {}]  }
   0x1   :  { %444 = vmatprep.subr.bf16.mxu0 %v470_v0  ;;  %v25_v1 = vld [vmem:[%s581_s3] sm:$0xff]  ;;  %v26_v2 = vld [vmem:[%s581_s3 + $0x8] sm:$0xff]  ;;  %vm446_vm1 = vmpackc.low %vm35_vm0, %vm35_vm0  ;;  %448 = vmatprep.subr.bf16.mxu1 %v470_v0  ;;  %v194_v10 = vstv %s583_s0  ;;  %vm197_vm3 = vcmask 130048   ;;  %s224_s18 = ssub.f32 1.0, %s585_s1  ;;  %p223_p0 = scmp.lt.f32.partialorder %s585_s1, 1.0  ;;  %v216_v39 = vstv %s585_s1 }
   0x2   :  { %v445_v3 = vpack.c.bf16 %v26_v2, %v25_v1  ;;  %v27_v4 = vld [vmem:[%s581_s3 + $0x10] sm:$0xff]  ;;  %v28_v5 = vld [vmem:[%s581_s3 + $0x18] sm:$0xff]  ;;  %420 = vmatprep.mubr.msk.f32.mxu0 %vm471_vm2, %v472_v6  ;;  %427 = vmatprep.mubr.msk.f32.mxu1 %vm471_vm2, %v472_v6  ;;  %v23_v8 = vld [vmem:[%s582_s2] sm:$0xff] }
   0x3   :  { %v449_v7 = vpack.c.bf16 %v28_v5, %v27_v4  ;;  %v24_v9 = vld [vmem:[%s582_s2 + $0x8] sm:$0xff]  ;;  %v29_v29 = vld [vmem:[%s584_s4] sm:$0xff]  ;;  %v31_v32 = vld [vmem:[%s584_s4 + $0x10] sm:$0xff]  ;;  %s225_s20 = smax.f32 %s473_s19, %s224_s18 }
   0x4   :  { %447 = vmatpush3.bf16.xpose.msk.msra.mxu0 %vm446_vm1, %v445_v3  ;;  %v30_v30 = vld [vmem:[%s584_s4 + $0x8] sm:$0xff]  ;;  %v32_v33 = vld [vmem:[%s584_s4 + $0x18] sm:$0xff]  ;;  %v226_v35 = vstv %s225_s20  ;;  %v33_v38 = vld [vmem:[%s586_s5] sm:$0xff]  ;;  %s233_s26 = scalar_select %p223_p0, 1, 0 }
   0x5   :  { %451 = vmatpush3.bf16.xpose.msk.msra.mxu1 %vm446_vm1, %v449_v7  ;;  %452 = vmatprep.subr.bf16.mxu0 %v470_v0  ;;  %v453_v31 = vpack.c.bf16 %v30_v30, %v29_v29  ;;  %v456_v34 = vpack.c.bf16 %v32_v33, %v31_v32  ;;  %vm217_vm4 = vcmp.ge.f32.partialorder %v33_v38, %v216_v39  ;;  %v34_v42 = vld [vmem:[%s586_s5 + $0x8] sm:$0xff] }
   0x6   :  { %455 = vmatprep.subr.bf16.mxu1 %v470_v0  ;;  %v234_v43 = vstv %s233_s26  ;;  %v400_v44 = vsel %vm217_vm4, 1.0, %v472_v6  ;;  %vm218_vm5 = vcmp.ge.f32.partialorder %v34_v42, %v216_v39 }
   0x7   :  { %vm235_vm6 = vcmp.eq.s32.totalorder %v234_v43, 1  ;;  %v401_v47 = vsel %vm218_vm5, 1.0, %v472_v6 }
   0xb   :  { %421 = vmatmul.mubr.msk.f32.vlgmr.msra.gmra.mrb[0].mxu0 %vm35_vm0, %v23_v8 }
   0xc   :  { %428 = vmatmul.mubr.msk.f32.vlgmr.msra.gmra.mrb[0].mxu1 %vm35_vm0, %v24_v9  ;;  %434 = vmatprep.mubr.msk.f32.mxu0 %vm471_vm2, %v472_v6 }
   0xd   :  { %441 = vmatprep.mubr.msk.f32.mxu1 %vm471_vm2, %v472_v6  ;;  %454 = vmatpush3.bf16.msra.mxu0 %v453_v31 }
   0xe   :  { %457 = vmatpush3.bf16.msra.mxu1 %v456_v34 }
  0xde   :  { %v111_v11 = vpop.f32.mrb[0].mxu0 }
  0xdf   :  { %v195_v12 = vmul.f32 %v194_v10, %v111_v11  ;;  %v422_v13 = vpop.f32.mrb[1].mxu0  ;;  %v190_v14 = vpop.f32.mrb[0].mxu1 }
  0xe0   :  { %v196_v15 = vmul.f32 %v194_v10, %v190_v14  ;;  %v429_v16 = vpop.f32.mrb[1].mxu1 }
  0xe1   :  { %v198_v17 = vsel %vm197_vm3, %v195_v12, -inf }
  0xe2   :  { %199 = vmax.xlane.f32.xlu0 %v198_v17  ;;  %v201_v18 = vsel %vm197_vm3, %v196_v15, -inf }
  0xe6   :  { %202 = vmax.xlane.f32.xlu0 %v201_v18 }
 0x16f   :  { %v200_v19 = vpop.xlane.xlu0 %199 }
 0x170   :  { %v204_v20 = vsub.f32 %v195_v12, %v200_v19 }
 0x172   :  { %v206_v21 = vmul.f32 1.442695, %v204_v20 }
 0x173   :  { %v203_v22 = vpop.xlane.xlu0 %202 }
 0x174   :  { %462 = vpow2.f32 %v206_v21  ;;  %v205_v23 = vsub.f32 %v196_v15, %v203_v22 }
 0x176   :  { %v208_v24 = vmul.f32 1.442695, %v205_v23 }
 0x178   :  { %464 = vpow2.f32 %v208_v24 }
 0x17e   :  { %v463_v25 = vpop.eup %462 }
 0x17f   :  { %v210_v26 = vsel %vm197_vm3, %v463_v25, 0.0  ;;  %v238_v46 = vmul.f32 %v463_v25, %v400_v44 }
 0x180   :  { %211 = vadd.xlane.f32.xlu1 %v210_v26 }
 0x182   :  { %v465_v27 = vpop.eup %464 }
 0x183   :  { %v213_v28 = vsel %vm197_vm3, %v465_v27, 0.0  ;;  %v239_v51 = vmul.f32 %v465_v27, %v401_v47 }
 0x184   :  { %214 = vadd.xlane.f32.xlu1 %v213_v28 }
 0x20d   :  { %v212_v36 = vpop.xlane.xlu1 %211 }
 0x20e   :  { %v227_v37 = vmul.f32 %v226_v35, %v212_v36 }
 0x210   :  { %466 = vrcp.f32 %v227_v37 }
 0x211   :  { %v215_v40 = vpop.xlane.xlu1 %214 }
 0x212   :  { %v228_v41 = vmul.f32 %v226_v35, %v215_v40 }
 0x214   :  { %468 = vrcp.f32 %v228_v41 }
 0x21a   :  { %v467_v45 = vpop.eup %466 }
 0x21b   :  { %v236_v48 = vsel %vm235_vm6, %v467_v45, 0.0 }
 0x21c   :  { %v240_v49 = vmul.f32 %v238_v46, %v236_v48 }
 0x21e   :  { %v469_v50 = vpop.eup %468  ;;  %435 = vmatmul.mubr.msk.f32.vlgmr.msra.gmra.mrb[2].mxu0 %vm197_vm3, %v240_v49 }
 0x21f   :  { %v237_v52 = vsel %vm235_vm6, %v469_v50, 0.0 }
 0x220   :  { %v241_v53 = vmul.f32 %v239_v51, %v237_v52 }
 0x222   :  { %442 = vmatmul.mubr.msk.f32.vlgmr.msra.gmra.mrb[2].mxu1 %vm197_vm3, %v241_v53 }
 0x2f1   :  { %v311_v54 = vpop.f32.mrb[2].mxu0 }
 0x2f2   :  { %388 = vst.msk [vmem:[%s587_s6] sm:$0xff] %vm35_vm0, %v311_v54  ;;  %v436_v55 = vpop.f32.mrb[3].mxu0 }
 0x2f5   :  { %v384_v56 = vpop.f32.mrb[2].mxu1 }
 0x2f6   :  { %389 = vst.msk [vmem:[%s587_s6 + $0x8] sm:$0xff] %vm35_vm0, %v384_v56  ;;  %v443_v57 = vpop.f32.mrb[3].mxu1 }

</bundles_post_ra>
